<compile_context>
chip_gen: v7x
topology: tpu7x:2x2x1
jax: 0.10.0
libtpu: 0.0.40
codegen_flags: <defaults>
</compile_context>

<pallas_src>
import jax
import jax.numpy as jnp
from jax.experimental import pallas as pl
from jax.experimental.pallas import tpu as pltpu


def _fadein_kernel(alpha_ref, a_ref, b_ref, o_ref):
    # alpha_ref: (1,) f32 scalar in SMEM; a_ref/b_ref/o_ref: (tile_rows, 128) VMEM tiles.
    alpha = alpha_ref[0]
    a = a_ref[...].astype(jnp.float32)
    b = b_ref[...].astype(jnp.float32)
    o_ref[...] = (a * (1.0 - alpha) + b * alpha).astype(o_ref.dtype)


def fadein(x0: jax.Array, x1: jax.Array, alpha) -> jax.Array:
    """out = x0 * (1 - alpha) + x1 * alpha  (any shape, x0/x1 same shape+dtype)."""
    assert x0.shape == x1.shape and x0.dtype == x1.dtype
    shape, dtype = x0.shape, x0.dtype
    total = int(x0.size)

    LANE = 128                                  # lane-dense last dim (full vregs)
    itemsize = jnp.dtype(dtype).itemsize
    sub = max(8, 32 // itemsize)                # sublane multiple: 8 (f32) / 16 (bf16)

    # Flatten (free for contiguous arrays); pad only if total isn't a lane multiple.
    a = x0.reshape(-1)
    b = x1.reshape(-1)
    pad = (-total) % LANE
    if pad:
        # Rare path: costs one extra copy pass of each input.
        a = jnp.pad(a, (0, pad))
        b = jnp.pad(b, (0, pad))
    rows = (total + pad) // LANE

    # ~1 MiB per input buffer per grid step; 3 arrays x 2 pipeline buffers ~ 6 MiB VMEM.
    target_rows = max(sub, ((1 << 20) // (LANE * itemsize)) // sub * sub)
    tile_rows = min(target_rows, ((rows + sub - 1) // sub) * sub)
    grid = (pl.cdiv(rows, tile_rows),)

    a2 = a.reshape(rows, LANE)
    b2 = b.reshape(rows, LANE)
    alpha_arr = jnp.asarray([alpha], dtype=jnp.float32)

    out2 = pl.pallas_call(
        _fadein_kernel,
        out_shape=jax.ShapeDtypeStruct((rows, LANE), dtype),
        grid_spec=pltpu.PrefetchScalarGridSpec(
            num_scalar_prefetch=0,
            grid=grid,
            in_specs=[
                pl.BlockSpec(memory_space=pltpu.MemorySpace.SMEM),       # alpha scalar
                pl.BlockSpec((tile_rows, LANE), lambda i: (i, 0)),       # x0 tile
                pl.BlockSpec((tile_rows, LANE), lambda i: (i, 0)),       # x1 tile
            ],
            out_specs=pl.BlockSpec((tile_rows, LANE), lambda i: (i, 0)),
        ),
        compiler_params=pltpu.CompilerParams(
            dimension_semantics=("parallel",),
            vmem_limit_bytes=32 * 1024 * 1024,   # safe on v5e/v6e/v7x
        ),
    )(alpha_arr, a2, b2)

    out = out2.reshape(-1)
    if pad:
        out = out[:total]
    return out.reshape(shape)


class FadeinLayer:
    """Mirror of the PyTorch module: alpha state lives on the host side."""

    def __init__(self, config=None):
        self.alpha = 0.0

    def update_alpha(self, delta):
        self.alpha = max(0.0, min(self.alpha + delta, 1.0))

    def __call__(self, x):
        # x is a pair/list of two equal-shaped tensors, like the PyTorch forward.
        return fadein(x[0], x[1], self.alpha)


def _reference(x0, x1, alpha):
    return (x0 * (1.0 - alpha) + x1 * alpha).astype(x0.dtype)


if __name__ == "__main__":
    key = jax.random.PRNGKey(0)
    k0, k1 = jax.random.split(key)
    x0 = jax.random.normal(k0, (2, 4, 16, 16), dtype=jnp.float32)  # NCHW
    x1 = jax.random.normal(k1, (2, 4, 16, 16), dtype=jnp.float32)

    layer = FadeinLayer()

    # alpha = 0.0 (module default): output must equal x0.
    out0 = jax.block_until_ready(layer((x0, x1)))
    assert out0.shape == x0.shape and out0.dtype == x0.dtype
    assert jnp.allclose(out0, _reference(x0, x1, 0.0), atol=1e-6, rtol=1e-6)

    # alpha = 0.3 after update_alpha.
    layer.update_alpha(0.3)
    out = jax.block_until_ready(layer((x0, x1)))
    assert out.shape == x0.shape and out.dtype == x0.dtype
    assert jnp.allclose(out, _reference(x0, x1, layer.alpha), atol=1e-6, rtol=1e-6)

    print("KERNEL_OK")
</pallas_src>

<mosaic_0001>
module attributes {stable_mosaic.version = 11 : i64} {
  func.func @_fadein_kernel(%arg0: i32, %arg1: memref<1xf32, #tpu.memory_space<smem>>, %arg2: memref<16x128xf32, #tpu.memory_space<vmem>>, %arg3: memref<16x128xf32, #tpu.memory_space<vmem>>, %arg4: memref<16x128xf32, #tpu.memory_space<vmem>>) attributes {dimension_semantics = [#tpu.dimension_semantics<parallel>], iteration_bounds = array<i64: 1>, scalar_prefetch = 0 : i64, scratch_operands = 0 : i64, tpu.core_type = #tpu.core_type<tc>, window_params = [{transform_indices = @transform_0, window_bounds = array<i64: 1>}, {transform_indices = @transform_1, window_bounds = array<i64: 16, 128>}, {transform_indices = @transform_2, window_bounds = array<i64: 16, 128>}, {transform_indices = @transform_3, window_bounds = array<i64: 16, 128>}]} {
    %c0 = arith.constant 0 : index
    %0 = memref.load %arg1[%c0] : memref<1xf32, #tpu.memory_space<smem>>
    %c0_0 = arith.constant 0 : index
    %c0_1 = arith.constant 0 : index
    %1 = vector.load %arg2[%c0_0, %c0_1] : memref<16x128xf32, #tpu.memory_space<vmem>>, vector<16x128xf32>
    %c0_2 = arith.constant 0 : index
    %c0_3 = arith.constant 0 : index
    %2 = vector.load %arg3[%c0_2, %c0_3] : memref<16x128xf32, #tpu.memory_space<vmem>>, vector<16x128xf32>
    %cst = arith.constant 1.000000e+00 : f32
    %3 = arith.subf %cst, %0 : f32
    %4 = vector.broadcast %3 : f32 to vector<16x128xf32>
    %5 = arith.mulf %1, %4 : vector<16x128xf32>
    %6 = vector.broadcast %0 : f32 to vector<16x128xf32>
    %7 = arith.mulf %2, %6 : vector<16x128xf32>
    %8 = arith.addf %5, %7 : vector<16x128xf32>
    %c0_4 = arith.constant 0 : index
    %c0_5 = arith.constant 0 : index
    %9 = vector.load %arg4[%c0_4, %c0_5] : memref<16x128xf32, #tpu.memory_space<vmem>>, vector<16x128xf32>
    tpu.vector_store %arg4[%c0_4, %c0_5], %8 {strides = array<i32>} : memref<16x128xf32, #tpu.memory_space<vmem>>, vector<16x128xf32>,
    return
  }
  func.func @transform_0(%arg0: i32) -> i32 {
    %c0_i32 = arith.constant 0 : i32
    %c0_i32_0 = arith.constant 0 : i32
    return %c0_i32 : i32
  }
  func.func @transform_1(%arg0: i32) -> (i32, i32) {
    %c0_i32 = arith.constant 0 : i32
    %c0_i32_0 = arith.constant 0 : i32
    return %arg0, %c0_i32 : i32, i32
  }
  func.func @transform_2(%arg0: i32) -> (i32, i32) {
    %c0_i32 = arith.constant 0 : i32
    %c0_i32_0 = arith.constant 0 : i32
    return %arg0, %c0_i32 : i32, i32
  }
  func.func @transform_3(%arg0: i32) -> (i32, i32) {
    %c0_i32 = arith.constant 0 : i32
    %c0_i32_0 = arith.constant 0 : i32
    return %arg0, %c0_i32 : i32, i32
  }
}

</mosaic_0001>

<bundles_post_ra>
// kernel: tpu_custom_call.1
= control target key start
LH: loop header
LB: loop body
LE: loop exit
PB: predicated region body
PF: predicated region fallthrough
CT: control target
= control target key end

     0   :  { %9 = vsyncpa [#allocation4], 0  ;;  %s231_s0 = inlined_call_operand.<no memory space> [shape: f32[1], index: 0, kind: input, shape index: {}]   ;;  %s232_s1 = inlined_call_operand.hbm [shape: f32[16,128], index: 1, kind: input, shape index: {}]   ;;  %s233_s2 = inlined_call_operand.hbm [shape: f32[16,128], index: 2, kind: input, shape index: {}]   ;;  %s234_s3 = inlined_call_operand.hbm [shape: f32[16,128], index: 3, kind: output, shape index: {}]  }
   0x1   :  { %10 = vsyncpa [#allocation7], 0 }
   0x2   :  { %11 = vsyncpa [#allocation5], 0  ;;  %s155_s12 = smov [#allocation3]   ;;  %s83_s16 = scalar_lea.hbm %s232_s1, 256 }
   0x3   :  { %s19_s13 = sshll.u32 %s155_s12, 4  ;;  %p84_p0 = scmp.ne.s32.totalorder %s232_s1, %s83_s16  ;;  %s20_s13 = int_to_ptr.vmem [resolvable:$true] %s19_s13 }
   0x4   :  { %p87_p1 = scmp.lt.u32.totalorder %s83_s16, %s232_s1 }
   0x6   :  { %p89_p2 = pnand %p87_p1, %p84_p0 }
   0x8   :  { %92 = shalt.err (!%p89_p2)
}
   0x9   :  { %s93_s21 = scalar_lea.vmem %s20_s13, 256  ;;  %p98_p4 = scmp.lt.s32.totalorder %s20_s13, %s20_s13 }
   0xa   :  { %p94_p3 = scmp.ne.s32.totalorder %s20_s13, %s93_s21  ;;  %p99_p5 = scmp.lt.s32.totalorder %s93_s21, %s93_s21 }
   0xc   :  { %p100_p6 = por %p99_p5, %p98_p4 }
   0xe   :  { %p101_p7 = pnand %p100_p6, %p94_p3 }
  0x10   :  { %104 = shalt.err (!%p101_p7)
}
  0x11   :  { %s156_s22 = smov 128   ;;  %s157_s23 = smov 8  }
  0x12   :  { %25 = dma.hbm_to_vmem [thread:$0]  %s232_s1, 256, %s20_s13, [#allocation4], %s156_s22, %s156_s22, %s157_s23  }
  0x13   :  { %s158_s26 = smov [#allocation6]   ;;  %s105_s30 = scalar_lea.hbm %s233_s2, 256 }
  0x14   :  { %s31_s27 = sshll.u32 %s158_s26, 4  ;;  %p106_p8 = scmp.ne.s32.totalorder %s233_s2, %s105_s30  ;;  %s32_s27 = int_to_ptr.vmem [resolvable:$true] %s31_s27 }
  0x15   :  { %p109_p9 = scmp.lt.u32.totalorder %s105_s30, %s233_s2 }
  0x17   :  { %p111_p10 = pnand %p109_p9, %p106_p8 }
  0x19   :  { %114 = shalt.err (!%p111_p10)
}
  0x1a   :  { %s115_s8 = scalar_lea.vmem %s32_s27, 256  ;;  %p120_p12 = scmp.lt.s32.totalorder %s32_s27, %s32_s27 }
  0x1b   :  { %p116_p11 = scmp.ne.s32.totalorder %s32_s27, %s115_s8  ;;  %p121_p13 = scmp.lt.s32.totalorder %s115_s8, %s115_s8 }
  0x1d   :  { %p122_p0 = por %p121_p13, %p120_p12 }
  0x1f   :  { %p123_p1 = pnand %p122_p0, %p116_p11 }
  0x21   :  { %126 = shalt.err (!%p123_p1)
}
  0x22   :  { %37 = dma.hbm_to_vmem [thread:$0]  %s233_s2, 256, %s32_s27, [#allocation7], %s156_s22, %s156_s22, %s157_s23  }
  0x23   :  { %149 = dma.done.wait [#allocation4], 256  }
  0x24   :  { %150 = vsyncadd [#allocation4], 4294967040 }
  0x25   :  { %151 = dma.done.wait [#allocation7], 256  }
  0x26   :  { %152 = vsyncadd [#allocation7], 4294967040  ;;  %s49_s12 = ssub.f32 1.0, %s231_s0  ;;  %v53_v1 = vstv %s231_s0  ;;  %v45_v2 = vld [vmem:[#allocation3] sm:$0xff]  ;;  %v47_v3 = vld [vmem:[#allocation6] sm:$0xff]  ;;  %s159_s2 = smov [#allocation8]  }
  0x27   :  { %v46_v4 = vld [vmem:[#allocation3 + $0x8] sm:$0xff]  ;;  %v54_v6 = vmul.f32 %v53_v1, %v47_v3  ;;  %v48_v7 = vld [vmem:[#allocation6 + $0x8] sm:$0xff]  ;;  %s65_s15 = sshll.u32 %s159_s2, 4  ;;  %s66_s15 = int_to_ptr.vmem [resolvable:$true] %s65_s15 }
  0x28   :  { %v50_v0 = vstv %s49_s12  ;;  %v55_v9 = vmul.f32 %v53_v1, %v48_v7  ;;  %s127_s16 = scalar_lea.vmem %s66_s15, 256  ;;  %p132_p3 = scmp.lt.s32.totalorder %s66_s15, %s66_s15 }
  0x29   :  { %v51_v5 = vmul.f32 %v50_v0, %v45_v2  ;;  %v52_v8 = vmul.f32 %v50_v0, %v46_v4  ;;  %p128_p2 = scmp.ne.s32.totalorder %s66_s15, %s127_s16  ;;  %p133_p4 = scmp.lt.s32.totalorder %s127_s16, %s127_s16 }
  0x2b   :  { %v56_v10 = vadd.f32 %v54_v6, %v51_v5  ;;  %v57_v11 = vadd.f32 %v55_v9, %v52_v8  ;;  %p134_p5 = por %p133_p4, %p132_p3 }
  0x2d   :  { %58 = vst [vmem:[#allocation8] sm:$0xff] %v56_v10  ;;  %59 = vst [vmem:[#allocation8 + $0x8] sm:$0xff] %v57_v11  ;;  %p135_p6 = pnand %p134_p5, %p128_p2 }
  0x2f   :  { %138 = shalt.err (!%p135_p6)
}
  0x30   :  { %s139_s18 = scalar_lea.hbm %s234_s3, 256 }
  0x31   :  { %p140_p7 = scmp.ne.s32.totalorder %s234_s3, %s139_s18  ;;  %p143_p8 = scmp.lt.u32.totalorder %s139_s18, %s234_s3 }
  0x33   :  { %p145_p9 = pnand %p143_p8, %p140_p7 }
  0x35   :  { %148 = shalt.err (!%p145_p9)
}
  0x36   :  { %71 = dma.vmem_to_hbm [thread:$0]  %s66_s15, 256, %s234_s3, [#allocation5], %s156_s22, %s156_s22, %s157_s23  }
  0x37   :  { %153 = dma.done.wait [#allocation5], 256  }
  0x38   :  { %154 = vsyncadd [#allocation5], 4294967040 }
  0x39   :  { %75 = vsyncpa [#allocation4], 1 }
  0x3a   :  { %76 = vsyncpa [#allocation7], 1 }
  0x3b   :  { %77 = vsyncpa [#allocation5], 1 }

</bundles_post_ra>
